<compile_context>
chip_gen: v6e
topology: v6e:2x2x1
jax: 0.10.0
libtpu: 0.0.40
codegen_flags: <defaults>
</compile_context>

<pallas_src>
import functools
import math

import jax
import jax.numpy as jnp
from jax.experimental import pallas as pl
from jax.experimental.pallas import tpu as pltpu


def _round_up(n, m):
    return ((n + m - 1) // m) * m


def _cdiv(a, b):
    return -(-a // b)


def init_params(key, input_size, hidden_size, output_size):
    """PyTorch nn.Linear-style init. Weights stored (in, out), biases (1, out)."""
    dims = [(input_size, hidden_size),
            (hidden_size, 7),
            (7, hidden_size),
            (hidden_size, output_size)]
    params = {}
    keys = jax.random.split(key, 2 * len(dims))
    for idx, (fan_in, fan_out) in enumerate(dims):
        bound = 1.0 / math.sqrt(fan_in)
        params[f"w{idx + 1}"] = jax.random.uniform(
            keys[2 * idx], (fan_in, fan_out), minval=-bound, maxval=bound,
            dtype=jnp.float32)
        params[f"b{idx + 1}"] = jax.random.uniform(
            keys[2 * idx + 1], (1, fan_out), minval=-bound, maxval=bound,
            dtype=jnp.float32)
    return params


def pack_params(params, compute_dtype=jnp.float32):
    """One-time packing of the 4 Linear layers into two lane-dense slabs.

    * The 7-wide bottleneck is zero-padded to 8 (inert: relu(0 + 0) = 0 and the
      padded w3 rows are zero, so downstream results are unchanged).
    * Every weight W:(din, dout) becomes kron(I8, W):(8*din, 8*dout), so one
      packed activation row holding 8 batch rows side-by-side is mapped layer
      to layer without mixing batch rows.
    * Weights are stacked (zero-padded to a common width) into one slab stored
      in `compute_dtype`; the 4 tiled biases go into a small f32 slab so the
      bias-add / ReLU stay f32 even on the bf16 path (fine on v5e too).
    """
    w1, b1 = params["w1"], params["b1"]
    w2, b2 = params["w2"], params["b2"]
    w3, b3 = params["w3"], params["b3"]
    w4, b4 = params["w4"], params["b4"]

    dmid = w2.shape[1]
    dm = _round_up(dmid, 8)
    if dm != dmid:
        w2 = jnp.pad(w2, ((0, 0), (0, dm - dmid)))
        b2 = jnp.pad(b2, ((0, 0), (0, dm - dmid)))
        w3 = jnp.pad(w3, ((0, dm - dmid), (0, 0)))

    eye8 = jnp.eye(8, dtype=jnp.float32)
    ws = [jnp.kron(eye8, w.astype(jnp.float32)) for w in (w1, w2, w3, w4)]
    bs = [jnp.tile(b.astype(jnp.float32), (1, 8)) for b in (b1, b2, b3, b4)]

    cmax = max(w.shape[1] for w in ws)

    def pad_cols(a):
        return jnp.pad(a, ((0, 0), (0, cmax - a.shape[1])))

    w_slab = jnp.concatenate([pad_cols(w) for w in ws], axis=0)
    rows = w_slab.shape[0]
    # Round rows to a multiple of 16 so the slab also matches the native bf16
    # (16, 128) tile on the bf16 path.
    w_slab = jnp.pad(w_slab, ((0, _round_up(rows, 16) - rows), (0, 0)))
    b_slab = jnp.concatenate([pad_cols(b) for b in bs], axis=0)

    return {"w_slab": w_slab.astype(compute_dtype),
            "b_slab": b_slab.astype(jnp.float32)}


def _make_kernel(din8, dh8, dm8, dout8):
    # Static row offsets of each block-diagonal weight inside the slab.
    r1 = din8            # rows [0,  r1) : W1 (din8, dh8)
    r2 = r1 + dh8        # rows [r1, r2) : W2 (dh8,  dm8)
    r3 = r2 + dm8        # rows [r2, r3) : W3 (dm8,  dh8)
    r4 = r3 + dh8        # rows [r3, r4) : W4 (dh8,  dout8)

    def kernel(x_ref, w_ref, b_ref, o_ref):
        cdt = w_ref.dtype        # compute dtype of MXU operands (f32 or bf16)
        # fc1 + relu. MXU accumulation is f32; bias add / ReLU stay f32.
        h = jnp.dot(x_ref[...].astype(cdt), w_ref[0:r1, 0:dh8],
                    preferred_element_type=jnp.float32)
        h = jnp.maximum(h + b_ref[0:1, 0:dh8], 0.0)
        # fc2 (hidden -> 8, zero-padded from 7) + relu
        h = jnp.dot(h.astype(cdt), w_ref[r1:r2, 0:dm8],
                    preferred_element_type=jnp.float32)
        h = jnp.maximum(h + b_ref[1:2, 0:dm8], 0.0)
        # fc3 (8 -> hidden) + relu
        h = jnp.dot(h.astype(cdt), w_ref[r2:r3, 0:dh8],
                    preferred_element_type=jnp.float32)
        h = jnp.maximum(h + b_ref[2:3, 0:dh8], 0.0)
        # fc4 (hidden -> output); the (rt, 8*out) block is lane-dense, so this
        # lowers to full-width unmasked stores.
        o = jnp.dot(h.astype(cdt), w_ref[r3:r4, 0:dout8],
                    preferred_element_type=jnp.float32)
        o_ref[...] = (o + b_ref[3:4, 0:dout8]).astype(o_ref.dtype)

    return kernel


def simple_mlp_pallas(x, packed, *, hidden_size, output_size, bottleneck_size=7,
                      batch_tile=8192, vmem_limit_bytes=None):
    """Fused Simple_MLP forward.

    x: (B, input_size) float32 (kept f32 in HBM even on the bf16-weight path;
       compute-dtype casts happen in-kernel, so input fidelity in HBM is never
       reduced by the wrapper).
    packed: output of pack_params(params, compute_dtype).
    batch_tile: batch rows per grid step (internally /8 packed rows).
    """
    B, din = x.shape
    dh, dout = hidden_size, output_size
    dm = _round_up(bottleneck_size, 8)
    din8, dh8, dm8, dout8 = 8 * din, 8 * dh, 8 * dm, 8 * dout

    w_slab, b_slab = packed["w_slab"], packed["b_slab"]
    cmax = max(dh8, dm8, dout8)
    if (w_slab.shape[1] != cmax or b_slab.shape != (4, cmax)
            or w_slab.shape[0] < din8 + 2 * dh8 + dm8):
        raise ValueError("packed params do not match the given layer sizes")

    # Pack 8 batch rows per lane row. The reshape of a contiguous row-major
    # array is free; x is only copied (padded) when B is not a multiple of 8.
    B8 = _round_up(B, 8)
    if B8 != B:
        x = jnp.pad(x, ((0, B8 - B), (0, 0)))
    R = B8 // 8
    xp = x.reshape(R, din8)

    # Packed-row tile: large (amortises per-step overhead), multiple of 8
    # sublanes, capped so the grid has >=2 steps whenever possible -- v7x can
    # then shard the "parallel" axis across its 2 TensorCores (no-op on
    # v5e/v6e). Ragged last blocks are masked by Pallas: garbage rows only
    # reach output rows that are never written back / already discarded.
    rt = max(1, batch_tile // 8)
    if R > 8:
        rt = min(rt, _round_up(_cdiv(R, 2), 8))
    if rt >= R:
        rt = R
    else:
        rt = max(8, (rt // 8) * 8)
        rt = min(rt, R)
    grid = (_cdiv(R, rt),)

    if vmem_limit_bytes is None:
        slab_bytes = (w_slab.size * w_slab.dtype.itemsize
                      + b_slab.size * b_slab.dtype.itemsize)
        block_bytes = 4 * rt * (din8 + dout8)        # one x block + one out block
        temp_bytes = 4 * 4 * rt * max(dh8, dm8)      # f32 intermediates headroom
        need = 2 * block_bytes + 2 * slab_bytes + temp_bytes
        # 2x margin, >=16 MiB, <=48 MiB (safe on v7x's 64 MiB physical VMEM,
        # comfortably inside v5e/v6e's 128 MiB).
        vmem_limit_bytes = int(min(max(2 * need, 16 << 20), 48 << 20))

    kernel = _make_kernel(din8, dh8, dm8, dout8)

    in_specs = [
        pl.BlockSpec((rt, din8), lambda i: (i, 0)),
        # Constant block index -> fetched once and kept resident across steps.
        pl.BlockSpec(w_slab.shape, lambda i: (0, 0)),
        pl.BlockSpec(b_slab.shape, lambda i: (0, 0)),
    ]
    out_spec = pl.BlockSpec((rt, dout8), lambda i: (i, 0))

    # Advisory cost estimate: x + out once, weight slabs counted once (resident).
    flops = 2 * R * (din8 * dh8 + dh8 * dm8 + dm8 * dh8 + dh8 * dout8)
    bytes_accessed = int(xp.size * xp.dtype.itemsize
                         + R * dout8 * 4
                         + w_slab.size * w_slab.dtype.itemsize
                         + b_slab.size * b_slab.dtype.itemsize)
    cost = pl.CostEstimate(flops=flops, transcendentals=0,
                           bytes_accessed=bytes_accessed)

    out_packed = pl.pallas_call(
        kernel,
        out_shape=jax.ShapeDtypeStruct((R, dout8), jnp.float32),
        grid_spec=pltpu.PrefetchScalarGridSpec(
            num_scalar_prefetch=0,
            grid=grid,
            in_specs=in_specs,
            out_specs=out_spec,
        ),
        compiler_params=pltpu.CompilerParams(
            dimension_semantics=("parallel",),
            vmem_limit_bytes=vmem_limit_bytes),
        cost_estimate=cost,
    )(xp, w_slab, b_slab)

    # Free (contiguous) reshape back to (B8, output); drop the <=7 padded rows.
    return out_packed.reshape(B8, dout)[:B]


def simple_mlp_ref(x, p):
    h = jnp.maximum(x @ p["w1"] + p["b1"], 0.0)
    h = jnp.maximum(h @ p["w2"] + p["b2"], 0.0)
    h = jnp.maximum(h @ p["w3"] + p["b3"], 0.0)
    return h @ p["w4"] + p["b4"]


if __name__ == "__main__":
    input_size, hidden_size, output_size = 32, 32, 16

    key = jax.random.PRNGKey(0)
    kx, kp, kx2, kx3 = jax.random.split(key, 4)
    params = init_params(kp, input_size, hidden_size, output_size)
    packed = pack_params(params)                      # pack once, reuse

    fwd = jax.jit(functools.partial(
        simple_mlp_pallas, hidden_size=hidden_size, output_size=output_size))
    fwd_small_tile = jax.jit(functools.partial(
        simple_mlp_pallas, hidden_size=hidden_size, output_size=output_size,
        batch_tile=256))

    # --- small batch (module-sized smoke test, single grid step) -------------
    x = jax.random.normal(kx, (8, input_size), dtype=jnp.float32)
    out = jax.block_until_ready(fwd(x, packed))
    ref = simple_mlp_ref(x, params)
    assert out.shape == (8, output_size)
    assert jnp.allclose(out, ref, atol=1e-4, rtol=1e-4)

    # --- larger batch, multi-step grid with a ragged last block --------------
    x2 = jax.random.normal(kx2, (1000, input_size), dtype=jnp.float32)
    out2 = jax.block_until_ready(fwd_small_tile(x2, packed))
    ref2 = simple_mlp_ref(x2, params)
    assert out2.shape == (1000, output_size)
    assert jnp.allclose(out2, ref2, atol=1e-4, rtol=1e-4)

    # --- batch not a multiple of 8 (exercises the only wrapper-side pad) -----
    x3 = jax.random.normal(kx3, (1001, input_size), dtype=jnp.float32)
    out3 = jax.block_until_ready(fwd(x3, packed))
    ref3 = simple_mlp_ref(x3, params)
    assert out3.shape == (1001, output_size)
    assert jnp.allclose(out3, ref3, atol=1e-4, rtol=1e-4)

    # --- bf16 weight path: x stays f32 in HBM, casts happen in-kernel --------
    packed_bf16 = pack_params(params, compute_dtype=jnp.bfloat16)
    out_bf16 = jax.block_until_ready(fwd_small_tile(x2, packed_bf16))
    assert out_bf16.shape == (1000, output_size)
    assert jnp.allclose(out_bf16, ref2, atol=1e-1, rtol=1e-1)

    print("KERNEL_OK")
</pallas_src>

<mosaic_0001>
module attributes {stable_mosaic.version = 11 : i64} {
  func.func @kernel(%arg0: i32, %arg1: memref<1x256xf32, #tpu.memory_space<vmem>>, %arg2: memref<832x256xf32, #tpu.memory_space<vmem>>, %arg3: memref<4x256xf32, #tpu.memory_space<vmem>>, %arg4: memref<1x128xf32, #tpu.memory_space<vmem>>) attributes {dimension_semantics = [#tpu.dimension_semantics<parallel>], iteration_bounds = array<i64: 1>, scalar_prefetch = 0 : i64, scratch_operands = 0 : i64, tpu.core_type = #tpu.core_type<tc>, window_params = [{transform_indices = @transform_0, window_bounds = array<i64: 1, 256>}, {pipeline_mode = #tpu.pipeline_mode<synchronous>, transform_indices = @transform_1, window_bounds = array<i64: 832, 256>}, {pipeline_mode = #tpu.pipeline_mode<synchronous>, transform_indices = @transform_2, window_bounds = array<i64: 4, 256>}, {transform_indices = @transform_3, window_bounds = array<i64: 1, 128>}]} {
    %c0 = arith.constant 0 : index
    %c0_0 = arith.constant 0 : index
    %0 = vector.load %arg1[%c0, %c0_0] : memref<1x256xf32, #tpu.memory_space<vmem>>, vector<1x256xf32>
    %c0_1 = arith.constant 0 : index
    %c0_2 = arith.constant 0 : index
    %1 = vector.load %arg2[%c0_1, %c0_2] : memref<832x256xf32, #tpu.memory_space<vmem>>, vector<256x256xf32>
    %cst = arith.constant dense<0.000000e+00> : vector<1x256xf32>
    %2 = tpu.matmul %0, %1, %cst {dimension_numbers = #tpu.dot_dimension_numbers<[1], [0], [0], [1], [0, 0, 1, 1], [], []>} : vector<1x256xf32>, vector<256x256xf32>, vector<1x256xf32> -> vector<1x256xf32>
    %c0_3 = arith.constant 0 : index
    %c0_4 = arith.constant 0 : index
    %3 = vector.load %arg3[%c0_3, %c0_4] : memref<4x256xf32, #tpu.memory_space<vmem>>, vector<1x256xf32>
    %4 = arith.addf %2, %3 : vector<1x256xf32>
    %cst_5 = arith.constant 0.000000e+00 : f32
    %5 = vector.broadcast %cst_5 : f32 to vector<1x256xf32>
    %6 = arith.maximumf %4, %5 : vector<1x256xf32>
    %c256 = arith.constant 256 : index
    %c0_6 = arith.constant 0 : index
    %7 = vector.load %arg2[%c256, %c0_6] : memref<832x256xf32, #tpu.memory_space<vmem>>, vector<256x64xf32>
    %cst_7 = arith.constant dense<0.000000e+00> : vector<1x64xf32>
    %8 = tpu.matmul %6, %7, %cst_7 {dimension_numbers = #tpu.dot_dimension_numbers<[1], [0], [0], [1], [0, 0, 1, 1], [], []>} : vector<1x256xf32>, vector<256x64xf32>, vector<1x64xf32> -> vector<1x64xf32>
    %c1 = arith.constant 1 : index
    %c0_8 = arith.constant 0 : index
    %9 = vector.load %arg3[%c1, %c0_8] : memref<4x256xf32, #tpu.memory_space<vmem>>, vector<1x64xf32>
    %10 = arith.addf %8, %9 : vector<1x64xf32>
    %cst_9 = arith.constant 0.000000e+00 : f32
    %11 = vector.broadcast %cst_9 : f32 to vector<1x64xf32>
    %12 = arith.maximumf %10, %11 : vector<1x64xf32>
    %c512 = arith.constant 512 : index
    %c0_10 = arith.constant 0 : index
    %13 = vector.load %arg2[%c512, %c0_10] : memref<832x256xf32, #tpu.memory_space<vmem>>, vector<64x256xf32>
    %cst_11 = arith.constant dense<0.000000e+00> : vector<1x256xf32>
    %14 = tpu.matmul %12, %13, %cst_11 {dimension_numbers = #tpu.dot_dimension_numbers<[1], [0], [0], [1], [0, 0, 1, 1], [], []>} : vector<1x64xf32>, vector<64x256xf32>, vector<1x256xf32> -> vector<1x256xf32>
    %c2 = arith.constant 2 : index
    %c0_12 = arith.constant 0 : index
    %15 = vector.load %arg3[%c2, %c0_12] : memref<4x256xf32, #tpu.memory_space<vmem>>, vector<1x256xf32>
    %16 = arith.addf %14, %15 : vector<1x256xf32>
    %cst_13 = arith.constant 0.000000e+00 : f32
    %17 = vector.broadcast %cst_13 : f32 to vector<1x256xf32>
    %18 = arith.maximumf %16, %17 : vector<1x256xf32>
    %c576 = arith.constant 576 : index
    %c0_14 = arith.constant 0 : index
    %19 = vector.load %arg2[%c576, %c0_14] : memref<832x256xf32, #tpu.memory_space<vmem>>, vector<256x128xf32>
    %cst_15 = arith.constant dense<0.000000e+00> : vector<1x128xf32>
    %20 = tpu.matmul %18, %19, %cst_15 {dimension_numbers = #tpu.dot_dimension_numbers<[1], [0], [0], [1], [0, 0, 1, 1], [], []>} : vector<1x256xf32>, vector<256x128xf32>, vector<1x128xf32> -> vector<1x128xf32>
    %c3 = arith.constant 3 : index
    %c0_16 = arith.constant 0 : index
    %21 = vector.load %arg3[%c3, %c0_16] : memref<4x256xf32, #tpu.memory_space<vmem>>, vector<1x128xf32>
    %22 = arith.addf %20, %21 : vector<1x128xf32>
    %c0_17 = arith.constant 0 : index
    %c0_18 = arith.constant 0 : index
    %23 = vector.load %arg4[%c0_17, %c0_18] : memref<1x128xf32, #tpu.memory_space<vmem>>, vector<1x128xf32>
    tpu.vector_store %arg4[%c0_17, %c0_18], %22 {strides = array<i32>} : memref<1x128xf32, #tpu.memory_space<vmem>>, vector<1x128xf32>,
    return
  }
  func.func @transform_0(%arg0: i32) -> (i32, i32) {
    %c0_i32 = arith.constant 0 : i32
    %c0_i32_0 = arith.constant 0 : i32
    return %arg0, %c0_i32 : i32, i32
  }
  func.func @transform_1(%arg0: i32) -> (i32, i32) {
    %c0_i32 = arith.constant 0 : i32
    %c0_i32_0 = arith.constant 0 : i32
    %c0_i32_1 = arith.constant 0 : i32
    return %c0_i32, %c0_i32_0 : i32, i32
  }
  func.func @transform_2(%arg0: i32) -> (i32, i32) {
    %c0_i32 = arith.constant 0 : i32
    %c0_i32_0 = arith.constant 0 : i32
    %c0_i32_1 = arith.constant 0 : i32
    return %c0_i32, %c0_i32_0 : i32, i32
  }
  func.func @transform_3(%arg0: i32) -> (i32, i32) {
    %c0_i32 = arith.constant 0 : i32
    %c0_i32_0 = arith.constant 0 : i32
    return %arg0, %c0_i32 : i32, i32
  }
}

</mosaic_0001>

<bundles_post_ra>
// kernel: simple_mlp_pallas.1
= control target key start
LH: loop header
LB: loop body
LE: loop exit
PB: predicated region body
PF: predicated region fallthrough
CT: control target
= control target key end

     0   :  { %8 = vsyncpa [#allocation3], 0  ;;  %s606_s12 = smov [#allocation2]   ;;  %s669_s0 = inlined_call_operand.vmem [shape: f32[1,256], index: 0, kind: input, shape index: {}]   ;;  %s670_s1 = inlined_call_operand.hbm [shape: f32[832,256], index: 1, kind: input, shape index: {}]   ;;  %s671_s2 = inlined_call_operand.vmem [shape: f32[4,256], index: 2, kind: input, shape index: {}]   ;;  %s672_s3 = inlined_call_operand.vmem [shape: f32[1,128], index: 3, kind: output, shape index: {}]  }
   0x1   :  { %s16_s13 = sshll.u32 %s606_s12, 4  ;;  %s17_s13 = int_to_ptr.vmem [resolvable:$true] %s16_s13 }
   0x2   :  { %s592_s14 = scalar_lea.vmem %s17_s13, 26624  ;;  %p597_p1 = scmp.lt.s32.totalorder %s17_s13, %s17_s13 }
   0x3   :  { %p593_p0 = scmp.ne.s32.totalorder %s17_s13, %s592_s14  ;;  %p598_p2 = scmp.lt.s32.totalorder %s592_s14, %s592_s14 }
   0x5   :  { %p599_p3 = por %p598_p2, %p597_p1 }
   0x7   :  { %p600_p4 = pnand %p599_p3, %p593_p0 }
   0x9   :  { %603 = shalt.err (!%p600_p4)
}
   0xa   :  { %s607_s15 = smov 256   ;;  %s608_s16 = smov 16  }
   0xb   :  { %22 = dma.hbm_to_vmem [thread:$0]  %s670_s1, 26624, %s17_s13, [#allocation3], %s607_s15, %s607_s15, %s608_s16  }
   0xc   :  { %604 = dma.done.wait [#allocation3], 26624  }
   0xd   :  { %605 = vsyncadd [#allocation3], 4294940672  ;;  %v60_v0 = vld [vmem:[#allocation2 + $0xf8] sm:$0xff]  ;;  %v59_v1 = vld [vmem:[#allocation2 + $0xf0] sm:$0xff]  ;;  %v95_v13 = vlaneseq  ;;  %vm322_vm0 = vcmask 523264  }
   0xe   :  { %v58_v2 = vld [vmem:[#allocation2 + $0xe8] sm:$0xff]  ;;  %116 = vmatprep.subr.mxu0 %v60_v0  ;;  %v57_v3 = vld [vmem:[#allocation2 + $0xe0] sm:$0xff]  ;;  %v56_v4 = vld [vmem:[#allocation2 + $0xd8] sm:$0xff] }
   0xf   :  { %117 = vmatpush1.msra.mxu0 %v59_v1  ;;  %v55_v5 = vld [vmem:[#allocation2 + $0xd0] sm:$0xff]  ;;  %v54_v6 = vld [vmem:[#allocation2 + $0xc8] sm:$0xff]  ;;  %v53_v7 = vld [vmem:[#allocation2 + $0xc0] sm:$0xff]  ;;  %v633_v18 = vshrl.u32 %v95_v13, 7 }
  0x10   :  { %118 = vmatprep.subr.mxu0 %v58_v2  ;;  %v52_v8 = vld [vmem:[#allocation2 + $0xb8] sm:$0xff]  ;;  %v51_v9 = vld [vmem:[#allocation2 + $0xb0] sm:$0xff]  ;;  %v50_v10 = vld [vmem:[#allocation2 + $0xa8] sm:$0xff] }
  0x11   :  { %119 = vmatpush1.msra.mxu0 %v57_v3  ;;  %v49_v11 = vld [vmem:[#allocation2 + $0xa0] sm:$0xff]  ;;  %v48_v12 = vld [vmem:[#allocation2 + $0x98] sm:$0xff]  ;;  %v47_v14 = vld [vmem:[#allocation2 + $0x90] sm:$0xff]  ;;  %v636_v23 = vsub.s32 1, %v633_v18 }
  0x12   :  { %120 = vmatprep.subr.mxu0 %v56_v4  ;;  %v46_v15 = vld [vmem:[#allocation2 + $0x88] sm:$0xff]  ;;  %v45_v16 = vld [vmem:[#allocation2 + $0x80] sm:$0xff]  ;;  %v44_v17 = vld [vmem:[#allocation2 + $0x78] sm:$0xff] }
  0x13   :  { %121 = vmatpush1.msra.mxu0 %v55_v5  ;;  %v43_v19 = vld [vmem:[#allocation2 + $0x70] sm:$0xff]  ;;  %v42_v20 = vld [vmem:[#allocation2 + $0x68] sm:$0xff]  ;;  %v41_v21 = vld [vmem:[#allocation2 + $0x60] sm:$0xff] }
  0x14   :  { %122 = vmatprep.subr.mxu0 %v54_v6  ;;  %v40_v22 = vld [vmem:[#allocation2 + $0x58] sm:$0xff]  ;;  %v39_v24 = vld [vmem:[#allocation2 + $0x50] sm:$0xff]  ;;  %v38_v25 = vld [vmem:[#allocation2 + $0x48] sm:$0xff] }
  0x15   :  { %123 = vmatpush1.msra.mxu0 %v53_v7  ;;  %v37_v26 = vld [vmem:[#allocation2 + $0x40] sm:$0xff]  ;;  %v220_v28 = vld [vmem:[#allocation2 + $0x3f0] sm:$0xff]  ;;  %v36_v29 = vld [vmem:[#allocation2 + $0x38] sm:$0xff] }
  0x16   :  { %124 = vmatprep.subr.mxu0 %v52_v8  ;;  %v641_v27 = vld [vmem:[%s669_s0] sm:$0x3]  ;;  %510 = vmatprep.subr.mxu1 %v220_v28  ;;  %v204_v31 = vld [vmem:[#allocation2 + $0x2f0] sm:$0xff]  ;;  %v34_v35 = vld [vmem:[#allocation2 + $0x28] sm:$0xff]  ;;  %v646_v28 = vsub.s32 0, %v633_v18 }
  0x17   :  { %125 = vmatpush1.msra.mxu0 %v51_v9  ;;  %v102_v30 = vrot.slane %v641_v27, %v636_v23  ;;  %v219_v32 = vld [vmem:[#allocation2 + $0x3e0] sm:$0xff]  ;;  %v35_v33 = vld [vmem:[#allocation2 + $0x30] sm:$0xff]  ;;  %511 = vmatpush3.msra.mxu1 %v204_v31  ;;  %v32_v39 = vld [vmem:[#allocation2 + $0x18] sm:$0xff] }
  0x18   :  { %126 = vmatprep.subr.mxu0 %v50_v10  ;;  %v203_v34 = vld [vmem:[#allocation2 + $0x2e0] sm:$0xff]  ;;  %v218_v36 = vld [vmem:[#allocation2 + $0x3d0] sm:$0xff]  ;;  %512 = vmatprep.subr.mxu1 %v219_v32  ;;  %v30_v43 = vld [vmem:[#allocation2 + $0x8] sm:$0xff] }
  0x19   :  { %127 = vmatpush1.msra.mxu0 %v49_v11  ;;  %180 = vmatprep.mubr.f32.mxu0 %v102_v30  ;;  %v33_v37 = vld [vmem:[#allocation2 + $0x20] sm:$0xff]  ;;  %v202_v38 = vld [vmem:[#allocation2 + $0x2d0] sm:$0xff]  ;;  %v92_v47 = vld [vmem:[#allocation2 + $0x1f8] sm:$0xff] }
  0x1a   :  { %128 = vmatprep.subr.mxu0 %v48_v12  ;;  %513 = vmatpush3.msra.mxu1 %v203_v34  ;;  %v217_v40 = vld [vmem:[#allocation2 + $0x3c0] sm:$0xff]  ;;  %v31_v41 = vld [vmem:[#allocation2 + $0x10] sm:$0xff]  ;;  %v90_v51 = vld [vmem:[#allocation2 + $0x1e8] sm:$0xff] }
  0x1b   :  { %129 = vmatpush1.msra.mxu0 %v47_v14  ;;  %514 = vmatprep.subr.mxu1 %v218_v36  ;;  %v201_v42 = vld [vmem:[#allocation2 + $0x2c0] sm:$0xff]  ;;  %v216_v44 = vld [vmem:[#allocation2 + $0x3b0] sm:$0xff]  ;;  %v88_v55 = vld [vmem:[#allocation2 + $0x1d8] sm:$0xff] }
  0x1c   :  { %130 = vmatprep.subr.mxu0 %v46_v15  ;;  %515 = vmatpush3.msra.mxu1 %v202_v38  ;;  %v29_v45 = vld [vmem:[#allocation2] sm:$0xff]  ;;  %v200_v46 = vld [vmem:[#allocation2 + $0x2b0] sm:$0xff]  ;;  %v86_v59 = vld [vmem:[#allocation2 + $0x1c8] sm:$0xff] }
  0x1d   :  { %131 = vmatpush1.msra.mxu0 %v45_v16  ;;  %516 = vmatprep.subr.mxu1 %v217_v40  ;;  %v215_v48 = vld [vmem:[#allocation2 + $0x3a0] sm:$0xff]  ;;  %v91_v49 = vld [vmem:[#allocation2 + $0x1f0] sm:$0xff]  ;;  %v84_v63 = vld [vmem:[#allocation2 + $0x1b8] sm:$0xff] }
  0x1e   :  { %132 = vmatprep.subr.mxu0 %v44_v17  ;;  %517 = vmatpush3.msra.mxu1 %v201_v42  ;;  %v199_v50 = vld [vmem:[#allocation2 + $0x2a0] sm:$0xff]  ;;  %v214_v52 = vld [vmem:[#allocation2 + $0x390] sm:$0xff]  ;;  %v82_v3 = vld [vmem:[#allocation2 + $0x1a8] sm:$0xff] }
  0x1f   :  { %133 = vmatpush1.msra.mxu0 %v43_v19  ;;  %518 = vmatprep.subr.mxu1 %v216_v44  ;;  %v89_v53 = vld [vmem:[#allocation2 + $0x1e0] sm:$0xff]  ;;  %v198_v54 = vld [vmem:[#allocation2 + $0x290] sm:$0xff]  ;;  %v80_v7 = vld [vmem:[#allocation2 + $0x198] sm:$0xff] }
  0x20   :  { %134 = vmatprep.subr.mxu0 %v42_v20  ;;  %519 = vmatpush3.msra.mxu1 %v200_v46  ;;  %v213_v56 = vld [vmem:[#allocation2 + $0x380] sm:$0xff]  ;;  %v87_v57 = vld [vmem:[#allocation2 + $0x1d0] sm:$0xff]  ;;  %v78_v11 = vld [vmem:[#allocation2 + $0x188] sm:$0xff] }
  0x21   :  { %135 = vmatpush1.msra.mxu0 %v41_v21  ;;  %520 = vmatprep.subr.mxu1 %v215_v48  ;;  %v197_v58 = vld [vmem:[#allocation2 + $0x280] sm:$0xff]  ;;  %v212_v60 = vld [vmem:[#allocation2 + $0x370] sm:$0xff]  ;;  %v76_v13 = vld [vmem:[#allocation2 + $0x178] sm:$0xff] }
  0x22   :  { %136 = vmatprep.subr.mxu0 %v40_v22  ;;  %521 = vmatpush3.msra.mxu1 %v199_v50  ;;  %v85_v61 = vld [vmem:[#allocation2 + $0x1c0] sm:$0xff]  ;;  %v196_v62 = vld [vmem:[#allocation2 + $0x270] sm:$0xff]  ;;  %v74_v15 = vld [vmem:[#allocation2 + $0x168] sm:$0xff] }
  0x23   :  { %137 = vmatpush1.msra.mxu0 %v39_v24  ;;  %522 = vmatprep.subr.mxu1 %v214_v52  ;;  %v211_v0 = vld [vmem:[#allocation2 + $0x360] sm:$0xff]  ;;  %v83_v1 = vld [vmem:[#allocation2 + $0x1b0] sm:$0xff]  ;;  %v72_v17 = vld [vmem:[#allocation2 + $0x158] sm:$0xff] }
  0x24   :  { %138 = vmatprep.subr.mxu0 %v38_v25  ;;  %523 = vmatpush3.msra.mxu1 %v198_v54  ;;  %v195_v2 = vld [vmem:[#allocation2 + $0x260] sm:$0xff]  ;;  %v210_v4 = vld [vmem:[#allocation2 + $0x350] sm:$0xff]  ;;  %v70_v20 = vld [vmem:[#allocation2 + $0x148] sm:$0xff] }
  0x25   :  { %139 = vmatpush1.msra.mxu0 %v37_v26  ;;  %524 = vmatprep.subr.mxu1 %v213_v56  ;;  %v81_v5 = vld [vmem:[#allocation2 + $0x1a0] sm:$0xff]  ;;  %v194_v6 = vld [vmem:[#allocation2 + $0x250] sm:$0xff]  ;;  %v68_v22 = vld [vmem:[#allocation2 + $0x138] sm:$0xff] }
  0x26   :  { %140 = vmatprep.subr.mxu0 %v36_v29  ;;  %525 = vmatpush3.msra.mxu1 %v197_v58  ;;  %v209_v8 = vld [vmem:[#allocation2 + $0x340] sm:$0xff]  ;;  %v79_v9 = vld [vmem:[#allocation2 + $0x190] sm:$0xff]  ;;  %v66_v25 = vld [vmem:[#allocation2 + $0x128] sm:$0xff] }
  0x27   :  { %141 = vmatpush1.msra.mxu0 %v35_v33  ;;  %526 = vmatprep.subr.mxu1 %v212_v60  ;;  %v193_v10 = vld [vmem:[#allocation2 + $0x240] sm:$0xff]  ;;  %v75_v14 = vld [vmem:[#allocation2 + $0x170] sm:$0xff]  ;;  %v64_v29 = vld [vmem:[#allocation2 + $0x118] sm:$0xff]  ;;  %v98_v33 = vrot.slane %v641_v27, %v646_v28 }
  0x28   :  { %142 = vmatprep.subr.mxu0 %v34_v35  ;;  %527 = vmatpush3.msra.mxu1 %v196_v62  ;;  %v77_v12 = vld [vmem:[#allocation2 + $0x180] sm:$0xff]  ;;  %v71_v19 = vld [vmem:[#allocation2 + $0x150] sm:$0xff]  ;;  %v62_v31 = vld [vmem:[#allocation2 + $0x108] sm:$0xff] }
  0x29   :  { %143 = vmatpush1.msra.mxu0 %v33_v37  ;;  %528 = vmatprep.subr.mxu1 %v211_v0  ;;  %v73_v16 = vld [vmem:[#allocation2 + $0x160] sm:$0xff]  ;;  %v67_v24 = vld [vmem:[#allocation2 + $0x130] sm:$0xff]  ;;  %v308_v27 = vld [vmem:[#allocation2 + $0x478] sm:$0xff] }
  0x2a   :  { %144 = vmatprep.subr.mxu0 %v32_v39  ;;  %529 = vmatpush3.msra.mxu1 %v195_v2  ;;  %v69_v21 = vld [vmem:[#allocation2 + $0x140] sm:$0xff]  ;;  %v63_v30 = vld [vmem:[#allocation2 + $0x110] sm:$0xff] }
  0x2b   :  { %145 = vmatpush1.msra.mxu0 %v31_v41  ;;  %530 = vmatprep.subr.mxu1 %v210_v4  ;;  %v65_v26 = vld [vmem:[#allocation2 + $0x120] sm:$0xff]  ;;  %v208_v34 = vld [vmem:[#allocation2 + $0x330] sm:$0xff] }
  0x2c   :  { %146 = vmatprep.subr.mxu0 %v30_v43  ;;  %531 = vmatpush3.msra.mxu1 %v194_v6  ;;  %v61_v32 = vld [vmem:[#allocation2 + $0x100] sm:$0xff]  ;;  %v192_v35 = vld [vmem:[#allocation2 + $0x230] sm:$0xff] }
  0x2d   :  { %147 = vmatpush1.msra.mxu0 %v29_v45  ;;  %532 = vmatprep.subr.mxu1 %v209_v8  ;;  %v207_v18 = vld [vmem:[#allocation2 + $0x320] sm:$0xff]  ;;  %v206_v37 = vld [vmem:[#allocation2 + $0x310] sm:$0xff] }
  0x2e   :  { %148 = vmatprep.subr.mxu0 %v92_v47  ;;  %533 = vmatpush3.msra.mxu1 %v193_v10  ;;  %v191_v36 = vld [vmem:[#allocation2 + $0x220] sm:$0xff]  ;;  %v190_v38 = vld [vmem:[#allocation2 + $0x210] sm:$0xff] }
  0x2f   :  { %149 = vmatpush2.msra.mxu0 %v91_v49  ;;  %534 = vmatprep.subr.mxu1 %v208_v34  ;;  %v205_v39 = vld [vmem:[#allocation2 + $0x300] sm:$0xff]  ;;  %v307_v50 = vld [vmem:[#allocation2 + $0x470] sm:$0xff] }
  0x30   :  { %150 = vmatprep.subr.mxu0 %v90_v51  ;;  %535 = vmatpush3.msra.mxu1 %v192_v35  ;;  %v189_v40 = vld [vmem:[#allocation2 + $0x200] sm:$0xff]  ;;  %v306_v51 = vld [vmem:[#allocation2 + $0x468] sm:$0xff]  ;;  %v303_v54 = vld [vmem:[#allocation2 + $0x450] sm:$0xff] }
  0x31   :  { %151 = vmatpush2.msra.mxu0 %v89_v53  ;;  %536 = vmatprep.subr.mxu1 %v207_v18  ;;  %v93_v41 = vld [vmem:[%s671_s2] ss:$4 sm:$0x3]  ;;  %v304_v53 = vld [vmem:[#allocation2 + $0x458] sm:$0xff]  ;;  %v299_v58 = vld [vmem:[#allocation2 + $0x430] sm:$0xff] }
  0x32   :  { %152 = vmatprep.subr.mxu0 %v88_v55  ;;  %537 = vmatpush3.msra.mxu1 %v191_v36  ;;  %v109_v42 = vrot.slane %v93_v41, %v646_v28  ;;  %v113_v43 = vrot.slane %v93_v41, %v636_v23  ;;  %v305_v52 = vld [vmem:[#allocation2 + $0x460] sm:$0xff]  ;;  %v302_v55 = vld [vmem:[#allocation2 + $0x448] sm:$0xff]  ;;  %v295_v62 = vld [vmem:[#allocation2 + $0x410] sm:$0xff] }
  0x33   :  { %153 = vmatpush2.msra.mxu0 %v87_v57  ;;  %538 = vmatprep.subr.mxu1 %v206_v37  ;;  %v301_v56 = vld [vmem:[#allocation2 + $0x440] sm:$0xff]  ;;  %v300_v57 = vld [vmem:[#allocation2 + $0x438] sm:$0xff]  ;;  %v430_v2 = vld [vmem:[#allocation2 + $0x670] sm:$0xff] }
  0x34   :  { %154 = vmatprep.subr.mxu0 %v86_v59  ;;  %539 = vmatpush3.msra.mxu1 %v190_v38  ;;  %v298_v59 = vld [vmem:[#allocation2 + $0x428] sm:$0xff]  ;;  %v297_v60 = vld [vmem:[#allocation2 + $0x420] sm:$0xff]  ;;  %v418_v18 = vld [vmem:[#allocation2 + $0x5b0] sm:$0xff] }
  0x35   :  { %155 = vmatpush2.msra.mxu0 %v85_v61  ;;  %540 = vmatprep.subr.mxu1 %v205_v39  ;;  %v296_v61 = vld [vmem:[#allocation2 + $0x418] sm:$0xff]  ;;  %v293_v0 = vld [vmem:[#allocation2 + $0x400] sm:$0xff]  ;;  %v402_v36 = vld [vmem:[#allocation2 + $0x4b0] sm:$0xff] }
  0x36   :  { %156 = vmatprep.subr.mxu0 %v84_v63  ;;  %541 = vmatpush3.msra.mxu1 %v189_v40  ;;  %v294_v63 = vld [vmem:[#allocation2 + $0x408] sm:$0xff]  ;;  %v221_v4 = vld [vmem:[%s671_s2 + $0x1] sm:$0x1]  ;;  %v416_v39 = vld [vmem:[#allocation2 + $0x590] sm:$0xff] }
  0x37   :  { %157 = vmatpush2.msra.mxu0 %v83_v1  ;;  %342 = vmatprep.subr.mxu1 %v308_v27  ;;  %v609_v1 = vmov 0.0   ;;  %v429_v10 = vld [vmem:[#allocation2 + $0x660] sm:$0xff]  ;;  %v400_v40 = vld [vmem:[#allocation2 + $0x490] sm:$0xff] }
  0x38   :  { %158 = vmatprep.subr.mxu0 %v82_v3  ;;  %v419_v34 = vld [vmem:[#allocation2 + $0x5c0] sm:$0xff] }
  0x39   :  { %159 = vmatpush2.msra.mxu0 %v81_v5  ;;  %v403_v35 = vld [vmem:[#allocation2 + $0x4c0] sm:$0xff] }
  0x3a   :  { %160 = vmatprep.subr.mxu0 %v80_v7  ;;  %v417_v37 = vld [vmem:[#allocation2 + $0x5a0] sm:$0xff] }
  0x3b   :  { %161 = vmatpush2.msra.mxu0 %v79_v9  ;;  %v414_v9 = vld [vmem:[#allocation2 + $0x570] sm:$0xff]  ;;  %v401_v38 = vld [vmem:[#allocation2 + $0x4a0] sm:$0xff] }
  0x3c   :  { %162 = vmatprep.subr.mxu0 %v78_v11  ;;  %v413_v11 = vld [vmem:[#allocation2 + $0x560] sm:$0xff] }
  0x3d   :  { %163 = vmatpush2.msra.mxu0 %v77_v12  ;;  %v428_v12 = vld [vmem:[#allocation2 + $0x650] sm:$0xff]  ;;  %v415_v27 = vld [vmem:[#allocation2 + $0x580] sm:$0xff] }
  0x3e   :  { %164 = vmatprep.subr.mxu0 %v76_v13  ;;  %v412_v13 = vld [vmem:[#allocation2 + $0x550] sm:$0xff]  ;;  %v399_v41 = vld [vmem:[#allocation2 + $0x480] sm:$0xff] }
  0x3f   :  { %165 = vmatpush2.msra.mxu0 %v75_v14  ;;  %v427_v14 = vld [vmem:[#allocation2 + $0x640] sm:$0xff] }
  0x40   :  { %166 = vmatprep.subr.mxu0 %v74_v15  ;;  %v411_v15 = vld [vmem:[#allocation2 + $0x540] sm:$0xff] }
  0x41   :  { %167 = vmatpush2.msra.mxu0 %v73_v16  ;;  %v426_v16 = vld [vmem:[#allocation2 + $0x630] sm:$0xff] }
  0x42   :  { %168 = vmatprep.subr.mxu0 %v72_v17  ;;  %v410_v17 = vld [vmem:[#allocation2 + $0x530] sm:$0xff] }
  0x43   :  { %169 = vmatpush2.msra.mxu0 %v71_v19  ;;  %v425_v19 = vld [vmem:[#allocation2 + $0x620] sm:$0xff] }
  0x44   :  { %170 = vmatprep.subr.mxu0 %v70_v20  ;;  %v409_v20 = vld [vmem:[#allocation2 + $0x520] sm:$0xff] }
  0x45   :  { %171 = vmatpush2.msra.mxu0 %v69_v21  ;;  %v424_v21 = vld [vmem:[#allocation2 + $0x610] sm:$0xff] }
  0x46   :  { %172 = vmatprep.subr.mxu0 %v68_v22  ;;  %v408_v22 = vld [vmem:[#allocation2 + $0x510] sm:$0xff] }
  0x47   :  { %173 = vmatpush2.msra.mxu0 %v67_v24  ;;  %v423_v24 = vld [vmem:[#allocation2 + $0x600] sm:$0xff] }
  0x48   :  { %174 = vmatprep.subr.mxu0 %v66_v25  ;;  %v407_v25 = vld [vmem:[#allocation2 + $0x500] sm:$0xff] }
  0x49   :  { %175 = vmatpush2.msra.mxu0 %v65_v26  ;;  %v422_v26 = vld [vmem:[#allocation2 + $0x5f0] sm:$0xff] }
  0x4a   :  { %176 = vmatprep.subr.mxu0 %v64_v29  ;;  %v406_v29 = vld [vmem:[#allocation2 + $0x4f0] sm:$0xff] }
  0x4b   :  { %177 = vmatpush2.msra.mxu0 %v63_v30  ;;  %v421_v30 = vld [vmem:[#allocation2 + $0x5e0] sm:$0xff] }
  0x4c   :  { %178 = vmatprep.subr.mxu0 %v62_v31  ;;  %v405_v31 = vld [vmem:[#allocation2 + $0x4e0] sm:$0xff] }
  0x4d   :  { %179 = vmatpush2.msra.mxu0 %v61_v32  ;;  %v420_v32 = vld [vmem:[#allocation2 + $0x5d0] sm:$0xff] }
  0x4e   :  { %181 = vmatmul.mubr.f32.vlgmr.msra.gmra.mxu0 %v98_v33  ;;  %v404_v33 = vld [vmem:[#allocation2 + $0x4d0] sm:$0xff] }
 0x10e   :  { %v182_v44 = vpop.f32.mrf.mxu0 }
 0x10f   :  { %v183_v45 = vadd.f32 %v182_v44, %v109_v42  ;;  %v508_v42 = vld [vmem:[%s671_s2 + $0x2] ss:$4 sm:$0x3] }
 0x110   :  { %v184_v46 = vpop.f32.mrf.mxu0  ;;  %v319_v44 = vrot.slane %v508_v42, %v636_v23 }
 0x111   :  { %v185_v47 = vadd.f32 %v184_v46, %v113_v43  ;;  %v187_v49 = vmax.f32 %v183_v45, 0.0  ;;  %v315_v43 = vrot.slane %v508_v42, %v646_v28 }
 0x113   :  { %v188_v48 = vmax.f32 %v185_v47, 0.0 }
 0x115   :  { %286 = vmatprep.mubr.f32.mxu1 %v188_v48 }
 0x116   :  { %287 = vmatmul.mubr.f32.vlgmr.msra.gmra.mxu1 %v187_v49 }
 0x117   :  { %343 = vmatpush1.msra.mxu1 %v307_v50  ;;  %390 = vmatprep.mubr.f32.mxu1 %v609_v1 }
 0x118   :  { %344 = vmatprep.subr.mxu1 %v306_v51 }
 0x119   :  { %345 = vmatpush1.msra.mxu1 %v305_v52  ;;  %v431_v52 = vld [vmem:[%s671_s2 + $0x3] sm:$0x1] }
 0x11a   :  { %346 = vmatprep.subr.mxu1 %v304_v53 }
 0x11b   :  { %347 = vmatpush1.msra.mxu1 %v303_v54 }
 0x11c   :  { %348 = vmatprep.subr.mxu1 %v302_v55 }
 0x11d   :  { %349 = vmatpush1.msra.mxu1 %v301_v56 }
 0x11e   :  { %350 = vmatprep.subr.mxu1 %v300_v57 }
 0x11f   :  { %351 = vmatpush1.msra.mxu1 %v299_v58 }
 0x120   :  { %352 = vmatprep.subr.mxu1 %v298_v59 }
 0x121   :  { %353 = vmatpush1.msra.mxu1 %v297_v60 }
 0x122   :  { %354 = vmatprep.subr.mxu1 %v296_v61 }
 0x123   :  { %355 = vmatpush1.msra.mxu1 %v295_v62 }
 0x124   :  { %356 = vmatprep.subr.mxu1 %v294_v63 }
 0x125   :  { %357 = vmatpush1.msra.mxu1 %v293_v0 }
 0x126   :  { %545 = vmatprep.subr.mxu1 %v430_v2 }
 0x1d6   :  { %v542_v3 = vpop.f32.mrf.mxu1 }
 0x1d8   :  { %v543_v5 = vpop.f32.mrf.mxu1 }
 0x1d9   :  { %v544_v6 = vadd.f32 %v543_v5, %v542_v3 }
 0x1db   :  { %v289_v7 = vadd.f32 %v544_v6, %v221_v4 }
 0x1dd   :  { %v292_v8 = vmax.f32 %v289_v7, 0.0 }
 0x1df   :  { %509 = vmatmul.mubr.msk.f32.vlgmr.msra.gmra.mxu1 %vm322_vm0, %v292_v8 }
 0x1e0   :  { %546 = vmatpush3.msra.mxu1 %v414_v9 }
 0x1e1   :  { %547 = vmatprep.subr.mxu1 %v429_v10 }
 0x1e2   :  { %548 = vmatpush3.msra.mxu1 %v413_v11 }
 0x1e3   :  { %549 = vmatprep.subr.mxu1 %v428_v12 }
 0x1e4   :  { %550 = vmatpush3.msra.mxu1 %v412_v13 }
 0x1e5   :  { %551 = vmatprep.subr.mxu1 %v427_v14 }
 0x1e6   :  { %552 = vmatpush3.msra.mxu1 %v411_v15 }
 0x1e7   :  { %553 = vmatprep.subr.mxu1 %v426_v16 }
 0x1e8   :  { %554 = vmatpush3.msra.mxu1 %v410_v17 }
 0x1e9   :  { %555 = vmatprep.subr.mxu1 %v425_v19 }
 0x1ea   :  { %556 = vmatpush3.msra.mxu1 %v409_v20 }
 0x1eb   :  { %557 = vmatprep.subr.mxu1 %v424_v21 }
 0x1ec   :  { %558 = vmatpush3.msra.mxu1 %v408_v22 }
 0x1ed   :  { %559 = vmatprep.subr.mxu1 %v423_v24 }
 0x1ee   :  { %560 = vmatpush3.msra.mxu1 %v407_v25 }
 0x1ef   :  { %561 = vmatprep.subr.mxu1 %v422_v26 }
 0x1f0   :  { %562 = vmatpush3.msra.mxu1 %v406_v29 }
 0x1f1   :  { %563 = vmatprep.subr.mxu1 %v421_v30 }
 0x1f2   :  { %564 = vmatpush3.msra.mxu1 %v405_v31 }
 0x1f3   :  { %565 = vmatprep.subr.mxu1 %v420_v32 }
 0x1f4   :  { %566 = vmatpush3.msra.mxu1 %v404_v33 }
 0x1f5   :  { %567 = vmatprep.subr.mxu1 %v419_v34 }
 0x1f6   :  { %568 = vmatpush3.msra.mxu1 %v403_v35 }
 0x1f7   :  { %569 = vmatprep.subr.mxu1 %v418_v18 }
 0x1f8   :  { %570 = vmatpush3.msra.mxu1 %v402_v36 }
 0x1f9   :  { %571 = vmatprep.subr.mxu1 %v417_v37 }
 0x1fa   :  { %572 = vmatpush3.msra.mxu1 %v401_v38 }
 0x1fb   :  { %573 = vmatprep.subr.mxu1 %v416_v39 }
 0x1fc   :  { %574 = vmatpush3.msra.mxu1 %v400_v40 }
 0x1fd   :  { %575 = vmatprep.subr.mxu1 %v415_v27 }
 0x1fe   :  { %576 = vmatpush3.msra.mxu1 %v399_v41 }
 0x29f   :  { %v392_v45 = vpop.f32.mrf.mxu1 }
 0x2a0   :  { %v393_v46 = vadd.f32 %v392_v45, %v315_v43 }
 0x2a1   :  { %v394_v47 = vpop.f32.mrf.mxu1 }
 0x2a2   :  { %v395_v48 = vadd.f32 %v394_v47, %v319_v44  ;;  %v397_v50 = vmax.f32 %v393_v46, 0.0 }
 0x2a4   :  { %v398_v49 = vmax.f32 %v395_v48, 0.0 }
 0x2a6   :  { %496 = vmatprep.mubr.f32.mxu1 %v398_v49 }
 0x2a7   :  { %497 = vmatmul.mubr.f32.vlgmr.msra.gmra.mxu1 %v397_v50 }
 0x367   :  { %v577_v51 = vpop.f32.mrf.mxu1 }
 0x369   :  { %v578_v53 = vpop.f32.mrf.mxu1 }
 0x36a   :  { %v579_v54 = vadd.f32 %v578_v53, %v577_v51 }
 0x36c   :  { %v499_v55 = vadd.f32 %v579_v54, %v431_v52 }
 0x36e   :  { %502 = vst [vmem:[%s672_s3] sm:$0x1] %v499_v55 }
 0x36f   :  { %507 = vsyncpa [#allocation3], 1 }

</bundles_post_ra>
